<compile_context>
chip_gen: v7x
topology: tpu7x:2x2x1
jax: 0.10.0
libtpu: 0.0.40
codegen_flags: <defaults>
</compile_context>

<pallas_src>
import functools

import jax
import jax.numpy as jnp
from jax.experimental import pallas as pl
from jax.experimental.pallas import tpu as pltpu

IGNORE_LABEL = -1
THRESH = 0.7
MIN_KEPT = 100000

_LANE = 128                       # pixels per vreg lane row
_MAX_TILE_PIX = 8192              # upper bound on pixels (lanes) per grid step
_MAX_BLOCK_BYTES = 4 * 1024 * 1024  # cap on a single logits block (Pallas double-buffers it)


def _choose_tile(hw_pad, c, itemsize):
    """Largest multiple-of-128 pixel tile <= caps that divides hw_pad."""
    by_vmem = (_MAX_BLOCK_BYTES // max(1, c * itemsize)) // _LANE * _LANE
    cap = min(_MAX_TILE_PIX, max(_LANE, by_vmem))
    t = cap
    while t > _LANE and hw_pad % t != 0:
        t -= _LANE
    if hw_pad % t != 0:
        t = _LANE  # 128 always divides hw_pad (hw_pad is rounded up to 128)
    return t


def _logp_kernel(logits_ref, target_ref, logp_ref, *, ignore_label):
    # logits_ref: (1, C, T) native dtype; target_ref: (1, 1, T) int32; logp_ref: (1, 1, T) f32
    x = logits_ref[...].astype(jnp.float32)            # cast in-kernel (bf16 stays bf16 in HBM)
    t = target_ref[...]
    valid = t != ignore_label                           # (1, 1, T)
    t0 = jnp.where(valid, t, 0)

    # numerically-stable log-softmax over the class (sublane) axis
    m = jnp.max(x, axis=1, keepdims=True)               # (1, 1, T)
    z = x - m
    lse = jnp.log(jnp.sum(jnp.exp(z), axis=1, keepdims=True))

    # gather z[target] via one-hot compare+select+sublane-sum (C is small)
    cls = jax.lax.broadcasted_iota(jnp.int32, x.shape, 1)
    z_t = jnp.sum(jnp.where(cls == t0, z, 0.0), axis=1, keepdims=True)
    logp_t = z_t - lse                                   # (1, 1, T)

    # +inf sentinel for ignored pixels: they sort last and never pass the keep test
    logp_ref[...] = jnp.where(valid, logp_t, jnp.inf)


def _ohem_reduce_kernel(thr_ref, logp_ref, sum_ref, cnt_ref):
    @pl.when((pl.program_id(0) == 0) & (pl.program_id(1) == 0))
    def _():
        sum_ref[...] = jnp.zeros_like(sum_ref)
        cnt_ref[...] = jnp.zeros_like(cnt_ref)

    thr = thr_ref[0]                                     # log-space threshold
    lp = logp_ref[...]                                   # (1, 1, T) f32
    keep = lp < thr                                      # ignored/padded (+inf) never kept
    sum_ref[...] += jnp.sum(jnp.where(keep, -lp, 0.0))   # loss = -log p_target
    cnt_ref[...] += jnp.sum(keep.astype(jnp.float32))


def ohem_cross_entropy(score, target, *, ignore_label=IGNORE_LABEL, thresh=THRESH,
                       min_kept=MIN_KEPT):
    """score: (N, C, H, W) float logits; target: (N, H, W) int labels (ignore_label allowed)."""
    # TODO(synk): per-class `weight` vector (None in this config) not implemented.
    n, c, ph, pw = score.shape
    h, w = target.shape[1], target.shape[2]
    if (ph, pw) != (h, w):
        # glue: bilinear resize, half-pixel centers == PyTorch align_corners=False
        score = jax.image.resize(score, (n, c, h, w), method="bilinear")

    hw = h * w
    logits = score.reshape(n, c, hw)                     # free reshape, no NCHW->NHWC transpose
    tgt = target.reshape(n, 1, hw).astype(jnp.int32)

    hw_pad = ((hw + _LANE - 1) // _LANE) * _LANE
    if hw_pad != hw:
        logits = jnp.pad(logits, ((0, 0), (0, 0), (0, hw_pad - hw)))
        tgt = jnp.pad(tgt, ((0, 0), (0, 0), (0, hw_pad - hw)), constant_values=ignore_label)

    tile = _choose_tile(hw_pad, c, jnp.dtype(logits.dtype).itemsize)
    n_tiles = hw_pad // tile
    grid = (n, n_tiles)

    # ---- kernel 1: per-pixel target-class log-prob (single lane-dense output) ----
    logp = pl.pallas_call(
        functools.partial(_logp_kernel, ignore_label=ignore_label),
        out_shape=jax.ShapeDtypeStruct((n, 1, hw_pad), jnp.float32),
        grid_spec=pltpu.PrefetchScalarGridSpec(
            num_scalar_prefetch=0,
            grid=grid,
            in_specs=[
                pl.BlockSpec((1, c, tile), lambda i, j: (i, 0, j)),
                pl.BlockSpec((1, 1, tile), lambda i, j: (i, 0, j)),
            ],
            out_specs=pl.BlockSpec((1, 1, tile), lambda i, j: (i, 0, j)),
        ),
        compiler_params=pltpu.CompilerParams(
            dimension_semantics=("parallel", "parallel")),
    )(logits, tgt)

    # ---- glue: OHEM threshold from the min_kept-th smallest valid prediction (log space) ----
    # pred = exp(logp) is monotone, so sorting / thresholding logp is equivalent.
    # TODO(synk): histogram-based k-th-smallest select to avoid the full device sort.
    logp_flat = logp.reshape(-1)
    n_valid = jnp.sum(logp_flat < jnp.inf).astype(jnp.int32)
    sorted_logp = jnp.sort(logp_flat)                    # +inf sentinels land at the end
    k = jnp.maximum(jnp.minimum(jnp.int32(min_kept), n_valid) - 1, 0)
    min_log = jnp.take(sorted_logp, k)
    log_thr = jnp.maximum(min_log, jnp.log(jnp.float32(thresh))).reshape(1)

    # ---- kernel 2: masked / thresholded sum + count reduction ----
    loss_sum, keep_cnt = pl.pallas_call(
        _ohem_reduce_kernel,
        out_shape=(jax.ShapeDtypeStruct((1, 1), jnp.float32),
                   jax.ShapeDtypeStruct((1, 1), jnp.float32)),
        grid_spec=pltpu.PrefetchScalarGridSpec(
            num_scalar_prefetch=0,
            grid=grid,
            in_specs=[
                pl.BlockSpec(memory_space=pltpu.MemorySpace.SMEM),   # log-threshold scalar
                pl.BlockSpec((1, 1, tile), lambda i, j: (i, 0, j)),
            ],
            out_specs=[
                pl.BlockSpec((1, 1), lambda i, j: (0, 0)),
                pl.BlockSpec((1, 1), lambda i, j: (0, 0)),
            ],
        ),
        compiler_params=pltpu.CompilerParams(
            dimension_semantics=("arbitrary", "arbitrary")),
    )(log_thr, logp)

    # mean over kept pixels (NaN if nothing is kept, matching torch .mean() on an empty tensor)
    return (loss_sum[0, 0] / keep_cnt[0, 0]).astype(jnp.float32)


def _reference(score, target, ignore_label=IGNORE_LABEL, thresh=THRESH, min_kept=MIN_KEPT):
    """Pure-JAX reference of the PyTorch forward (same-size score/target)."""
    n, c, h, w = score.shape
    logits = jnp.transpose(score, (0, 2, 3, 1)).reshape(-1, c).astype(jnp.float32)
    t = target.reshape(-1)
    valid = t != ignore_label
    t0 = jnp.where(valid, t, 0)
    logp = jax.nn.log_softmax(logits, axis=-1)
    logp_t = jnp.take_along_axis(logp, t0[:, None], axis=1)[:, 0]
    loss = jnp.where(valid, -logp_t, 0.0)
    pred = jnp.where(valid, jnp.exp(logp_t), jnp.inf)
    n_valid = jnp.sum(valid)
    sp = jnp.sort(pred)
    k = jnp.maximum(jnp.minimum(min_kept, n_valid) - 1, 0)
    threshold = jnp.maximum(sp[k], thresh)
    keep = valid & (pred < threshold)
    return jnp.sum(jnp.where(keep, loss, 0.0)) / jnp.sum(keep)


if __name__ == "__main__":
    key = jax.random.PRNGKey(0)
    k1, k2, k3 = jax.random.split(key, 3)

    N, C, H, W = 2, 4, 16, 16
    score = jax.random.normal(k1, (N, C, H, W), dtype=jnp.float32)
    target = jax.random.randint(k2, (N, H, W), 0, C, dtype=jnp.int32)
    ignore_mask = jax.random.uniform(k3, (N, H, W)) < 0.1
    target = jnp.where(ignore_mask, IGNORE_LABEL, target)

    out = ohem_cross_entropy(score, target)
    jax.block_until_ready(out)

    ref = _reference(score, target)
    assert jnp.allclose(out, ref, atol=1e-5, rtol=1e-5), (out, ref)

    print("KERNEL_OK")
</pallas_src>

<mosaic_0001>
module attributes {stable_mosaic.version = 11 : i64} {
  func.func @_logp_kernel(%arg0: i32, %arg1: i32, %arg2: memref<1x4x256xf32, #tpu.memory_space<vmem>>, %arg3: memref<1x1x256xi32, #tpu.memory_space<vmem>>, %arg4: memref<1x1x256xf32, #tpu.memory_space<vmem>>) attributes {dimension_semantics = [#tpu.dimension_semantics<parallel>, #tpu.dimension_semantics<parallel>], iteration_bounds = array<i64: 2, 1>, scalar_prefetch = 0 : i64, scratch_operands = 0 : i64, tpu.core_type = #tpu.core_type<tc>, window_params = [{transform_indices = @transform_0, window_bounds = array<i64: 1, 4, 256>}, {transform_indices = @transform_1, window_bounds = array<i64: 1, 1, 256>}, {transform_indices = @transform_2, window_bounds = array<i64: 1, 1, 256>}]} {
    %c0 = arith.constant 0 : index
    %c0_0 = arith.constant 0 : index
    %c0_1 = arith.constant 0 : index
    %0 = vector.load %arg2[%c0, %c0_0, %c0_1] : memref<1x4x256xf32, #tpu.memory_space<vmem>>, vector<1x4x256xf32>
    %c0_2 = arith.constant 0 : index
    %c0_3 = arith.constant 0 : index
    %c0_4 = arith.constant 0 : index
    %1 = vector.load %arg3[%c0_2, %c0_3, %c0_4] : memref<1x1x256xi32, #tpu.memory_space<vmem>>, vector<1x1x256xi32>
    %c-1_i32 = arith.constant -1 : i32
    %2 = vector.broadcast %c-1_i32 : i32 to vector<1x1x256xi32>
    %3 = arith.cmpi ne, %1, %2 : vector<1x1x256xi32>
    %c0_i32 = arith.constant 0 : i32
    %4 = vector.broadcast %c0_i32 : i32 to vector<1x1x256xi32>
    %5 = arith.select %3, %1, %4 : vector<1x1x256xi1>, vector<1x1x256xi32>
    %cst = arith.constant dense<0xFF800000> : vector<1x256xf32>
    %6 = vector.multi_reduction <maximumf>, %0, %cst [1] : vector<1x4x256xf32> to vector<1x256xf32>
    %7 = vector.shape_cast %6 : vector<1x256xf32> to vector<1x1x256xf32>
    %8 = vector.broadcast %7 : vector<1x1x256xf32> to vector<1x4x256xf32>
    %9 = arith.subf %0, %8 : vector<1x4x256xf32>
    %10 = math.exp %9 : vector<1x4x256xf32>
    %cst_5 = arith.constant dense<0.000000e+00> : vector<1x256xf32>
    %11 = vector.multi_reduction <add>, %10, %cst_5 [1] : vector<1x4x256xf32> to vector<1x256xf32>
    %12 = vector.shape_cast %11 : vector<1x256xf32> to vector<1x1x256xf32>
    %13 = math.log %12 : vector<1x1x256xf32>
    %14 = tpu.iota {dimensions = array<i32: 1>} : vector<1x4x256xi32>
    %15 = vector.broadcast %5 : vector<1x1x256xi32> to vector<1x4x256xi32>
    %16 = arith.cmpi eq, %14, %15 : vector<1x4x256xi32>
    %cst_6 = arith.constant 0.000000e+00 : f32
    %17 = vector.broadcast %cst_6 : f32 to vector<1x4x256xf32>
    %18 = arith.select %16, %9, %17 : vector<1x4x256xi1>, vector<1x4x256xf32>
    %cst_7 = arith.constant dense<0.000000e+00> : vector<1x256xf32>
    %19 = vector.multi_reduction <add>, %18, %cst_7 [1] : vector<1x4x256xf32> to vector<1x256xf32>
    %20 = vector.shape_cast %19 : vector<1x256xf32> to vector<1x1x256xf32>
    %21 = arith.subf %20, %13 : vector<1x1x256xf32>
    %cst_8 = arith.constant 0x7F800000 : f32
    %22 = vector.broadcast %cst_8 : f32 to vector<1x1x256xf32>
    %23 = arith.select %3, %21, %22 : vector<1x1x256xi1>, vector<1x1x256xf32>
    %c0_9 = arith.constant 0 : index
    %c0_10 = arith.constant 0 : index
    %c0_11 = arith.constant 0 : index
    %24 = vector.load %arg4[%c0_9, %c0_10, %c0_11] : memref<1x1x256xf32, #tpu.memory_space<vmem>>, vector<1x1x256xf32>
    tpu.vector_store %arg4[%c0_9, %c0_10, %c0_11], %23 {strides = array<i32>} : memref<1x1x256xf32, #tpu.memory_space<vmem>>, vector<1x1x256xf32>,
    return
  }
  func.func @transform_0(%arg0: i32, %arg1: i32) -> (i32, i32, i32) {
    %c0_i32 = arith.constant 0 : i32
    %c0_i32_0 = arith.constant 0 : i32
    return %arg0, %c0_i32, %arg1 : i32, i32, i32
  }
  func.func @transform_1(%arg0: i32, %arg1: i32) -> (i32, i32, i32) {
    %c0_i32 = arith.constant 0 : i32
    %c0_i32_0 = arith.constant 0 : i32
    return %arg0, %c0_i32, %arg1 : i32, i32, i32
  }
  func.func @transform_2(%arg0: i32, %arg1: i32) -> (i32, i32, i32) {
    %c0_i32 = arith.constant 0 : i32
    %c0_i32_0 = arith.constant 0 : i32
    return %arg0, %c0_i32, %arg1 : i32, i32, i32
  }
}

</mosaic_0001>

<bundles_post_ra>
// kernel: tpu_custom_call.1
= control target key start
LH: loop header
LB: loop body
LE: loop exit
PB: predicated region body
PF: predicated region fallthrough
CT: control target
= control target key end

     0   :  { %7 = vsyncpa [#allocation3], 0  ;;  %s956_s0 = inlined_call_operand.hbm [shape: f32[2,4,256], index: 0, kind: input, shape index: {}]   ;;  %s957_s1 = inlined_call_operand.hbm [shape: s32[2,1,256], index: 1, kind: input, shape index: {}]   ;;  %s958_s2 = inlined_call_operand.hbm [shape: f32[2,1,256], index: 2, kind: output, shape index: {}]  }
   0x1   :  { %9 = vsyncpa [#allocation3 + $0x1], 0 }
   0x2   :  { %10 = vsyncpa [#allocation6], 0 }
   0x3   :  { %12 = vsyncpa [#allocation6 + $0x1], 0 }
   0x4   :  { %13 = vsyncpa [#allocation4], 0 }
   0x5   :  { %15 = vsyncpa [#allocation4 + $0x1], 0  ;;  %s721_s9 = smov 0   ;;  %s723_s10 = smov 0  }
   0x6   :  { %s725_s11 = smov 0   ;;  %s727_s12 = smov 0  }
   0x7   :  { %s729_s13 = smov 0   ;;  %s731_s14 = smov 0  }
   0x8 LB: > { %s457_s15 = sadd.s32 4294967295, %s700_s14   ;;  %s458_s16 = sadd.s32 4294967294, %s700_s14   ;;  %s700_s14 = sphi %s731_s14, %s21_s14   ;;  %s696_s13 = sphi %s729_s13, %s978_s13   ;;  %s692_s12 = sphi %s727_s12, %s977_s12   ;;  %s688_s11 = sphi %s725_s11, %s976_s11   ;;  %s684_s10 = sphi %s723_s10, %s975_s10   ;;  %s680_s9 = sphi %s721_s9, %s974_s9  }
   0x9   : > { %s33_s17 = sadd.s32 1, %s696_s13  ;;  %s42_s18 = sadd.s32 1, %s688_s11 }
   0xa   : > { %p35_p0 = scmp.ge.s32.totalorder %s33_s17, 2  ;;  %p49_p1 = scmp.ne.s32.totalorder %s688_s11, %s684_s10 }
   0xb   : > { %p50_p2 = scmp.eq.s32.totalorder %s700_s14, 0  ;;  %p55_p3 = scmp.ne.s32.totalorder %s684_s10, %s680_s9 }
   0xc   : > { %s980_s17 = smov (%p35_p0, %s33_s17), 0  ;;  %p56_p5 = scmp.eq.s32.totalorder %s457_s15, 0 }
   0xd   : > { %p762_p4 = por %p50_p2, %p49_p1  ;;  %s37_s20 = ssub.s32 %s696_s13, %s980_s17 }
   0xe   : > { %p109_p6 = scmp.eq.s32.totalorder %s457_s15, 1  ;;  %p40_p7 = scmp.eq.s32.totalorder %s37_s20, 0 }
   0xf   : > { %p768_p8 = por %p56_p5, %p55_p3  ;;  %p115_p10 = scmp.eq.s32.totalorder %s458_s16, 1 }
  0x10   : > { %p772_p9 = por %p109_p6, %p49_p1  ;;  %p496_p13 = scmp.lt.s32.totalorder %s700_s14, 2 }
  0x11   : > { %s962_s21 = scalar_select %p768_p8, 1, 0 }
  0x12   : > { %s963_s22 = scalar_select %p772_p9, 1, 0 }
  0x13   : > { %s777_s23 = scalar_select %p40_p7, %s688_s11, %s42_s18  }
  0x14   : > { %p779_p11 = por %p115_p10, %p55_p3  ;;  %s786_s25 = sand.u32 1, %s688_s11  }
  0x15   : > { %s461_s26 = sshll.u32 %s786_s25, 3  ;;  %s476_s27 = sshll.u32 %s696_s13, 7 }
  0x16   : > { %s964_s24 = scalar_select %p779_p11, 1, 0 }
  0x17   : > { %s793_s30 = scalar_lea.hbm %s956_s0, %s476_s27  ;;  %s139_s3 = scalar_lea.vmem [#allocation2], %s461_s26 }
  0x18   : > { %s149_s4 = sshll.u32 %s139_s3, 4  ;;  %p799_p0 = pnand %p496_p13, %p762_p4  ;;  %s795_s4 = int_to_ptr.vmem [resolvable:$true] %s149_s4 }
  0x19   : > { %s136_s6 = scalar_lea.sflag [#allocation3], %s786_s25  ;;  %s554_s7 = scalar_lea.hbm %s793_s30, 128 }
  0x1a   : > { %p555_p3 = scmp.ne.s32.totalorder %s793_s30, %s554_s7  ;;  %p556_p5 = pneg %p799_p0 }
  0x1b   : > { %s559_s16 = scalar_lea.hbm %s956_s0, 256  ;;  %p560_p4 = scmp.lt.u32.totalorder %s793_s30, %s956_s0 }
  0x1c   : > { %p557_p6 = pnand %p556_p5, %p555_p3  ;;  %p561_p10 = scmp.lt.u32.totalorder %s559_s16, %s554_s7 }
  0x1d   : > { %p563_p12 = scmp.lt.u32.totalorder %s554_s7, %s793_s30 }
  0x1e   : > { %p558_p7 = pneg %p557_p6  ;;  %p562_p13 = por %p561_p10, %p560_p4 }
  0x20   : > { %p564_p1 = por %p563_p12, %p562_p13 }
  0x22   : > { %p565_p2 = pnand %p564_p1, %p558_p7 }
  0x24   : > { %568 = shalt.err (!%p565_p2)
}
  0x25   : > { %s569_s20 = scalar_lea.vmem %s795_s4, 128  ;;  %s702_s26 = smov [#allocation2]  }
  0x26   : > { %p570_p3 = scmp.ne.s32.totalorder %s795_s4, %s569_s20  ;;  %s574_s27 = sshll.u32 %s702_s26, 4  ;;  %s575_s27 = int_to_ptr.vmem [resolvable:$false] %s574_s27 }
  0x27   : > { %s576_s28 = scalar_lea.vmem %s575_s27, 256  ;;  %p577_p9 = scmp.lt.s32.totalorder %s795_s4, %s575_s27 }
  0x28   : > { %p572_p6 = pnand %p570_p3, %p556_p5  ;;  %p578_p4 = scmp.lt.s32.totalorder %s576_s28, %s569_s20 }
  0x2a   : > { %p573_p11 = pneg %p572_p6  ;;  %p579_p10 = por %p578_p4, %p577_p9 }
  0x2c   : > { %p580_p12 = pnand %p579_p10, %p573_p11 }
  0x2e   : > { %583 = shalt.err (!%p580_p12)
}
  0x2f   : > { %488 = dma.hbm_to_vmem [thread:$0]  (!%p799_p0), %s793_s30, 128, %s795_s4, %s136_s6  }
  0x30   : > { %p966_p1 = scmp.lt.s32.totalorder %s700_s14, 3  ;;  %p967_p2 = scmp.ge.s32.totalorder %s700_s14, 1 }
  0x31   : > { %s464_s3 = sshll.u32 %s786_s25, 1  ;;  %s477_s7 = sshll.u32 %s696_s13, 5 }
  0x32   : > { %p835_p7 = pnand %p967_p2, %p966_p1  ;;  %s844_s16 = scalar_lea.hbm %s957_s1, %s477_s7 }
  0x33   : > { %s160_s18 = scalar_lea.vmem [#allocation5], %s464_s3  ;;  %s157_s30 = scalar_lea.sflag [#allocation6], %s786_s25 }
  0x34   : > { %s968_s29 = scalar_select %p835_p7, 1, 0 }
  0x35   : > { %s170_s19 = sshll.u32 %s160_s18, 4  ;;  %s584_s4 = scalar_lea.hbm %s844_s16, 32  ;;  %s171_s19 = int_to_ptr.vmem [resolvable:$true] %s170_s19 }
  0x36   : > { %p585_p9 = scmp.ne.s32.totalorder %s844_s16, %s584_s4  ;;  %s589_s26 = scalar_lea.hbm %s957_s1, 64 }
  0x37   : > { %p590_p3 = scmp.lt.u32.totalorder %s844_s16, %s957_s1  ;;  %p591_p6 = scmp.lt.u32.totalorder %s589_s26, %s584_s4 }
  0x38   : > { %p587_p11 = pnand %p585_p9, %p556_p5  ;;  %p593_p10 = scmp.lt.u32.totalorder %s584_s4, %s844_s16 }
  0x39   : > { %p592_p4 = por %p591_p6, %p590_p3 }
  0x3a   : > { %p588_p13 = pneg %p587_p11 }
  0x3b   : > { %p594_p12 = por %p593_p10, %p592_p4 }
  0x3d   : > { %p595_p1 = pnand %p594_p12, %p588_p13 }
  0x3f   : > { %598 = shalt.err (!%p595_p1)
}
  0x40   : > { %s599_s25 = scalar_lea.vmem %s171_s19, 32  ;;  %s703_s3 = smov [#allocation5]  }
  0x41   : > { %p600_p2 = scmp.ne.s32.totalorder %s171_s19, %s599_s25  ;;  %s604_s7 = sshll.u32 %s703_s3, 4  ;;  %s605_s7 = int_to_ptr.vmem [resolvable:$false] %s604_s7 }
  0x42   : > { %s606_s8 = scalar_lea.vmem %s605_s7, 64  ;;  %p607_p8 = scmp.lt.s32.totalorder %s171_s19, %s605_s7 }
  0x43   : > { %p602_p9 = pnand %p600_p2, %p556_p5  ;;  %p608_p7 = scmp.lt.s32.totalorder %s606_s8, %s599_s25 }
  0x45   : > { %p603_p11 = pneg %p602_p9  ;;  %p609_p3 = por %p608_p7, %p607_p8 }
  0x47   : > { %p610_p6 = pnand %p609_p3, %p603_p11 }
  0x49   : > { %613 = shalt.err (!%p610_p6)
}
  0x4a   : > { %491 = dma.hbm_to_vmem [thread:$0]  (!%p799_p0), %s844_s16, 32, %s171_s19, %s157_s30  }
  0x4b   : > { %p969_p13 = scmp.ne.s32.totalorder %s968_s29, 0 }
  0x4c   : > { %s869_s15 = sand.u32 (!%p969_p13), 1, %s684_s10   ;;  %p970_p5 = scmp.ne.s32.totalorder (!%p969_p13), %s962_s21, 0 }
  0x4d   : > { %179 = sbr.rel (%p969_p13) target bundleno = 172 (0xac), region = 28  ;;  %s468_s18 = sshll.u32 (!%p969_p13), %s869_s15, 3 }
  0x4e   : > { %s182_s4 = scalar_lea.sflag (!%p969_p13), [#allocation3], %s869_s15  ;;  %s185_s6 = scalar_lea.vmem (!%p969_p13), [#allocation2], %s468_s18 }
  0x54   : > { %667 = dma.done.wait (%p970_p5), %s182_s4, 128  }
  0x55   : > { %669 = vsyncadd (%p970_p5), %s182_s4, 4294967168  ;;  %s469_s5 = sshll.u32 %s869_s15, 1  ;;  %s191_s29 = scalar_lea.sflag [#allocation6], %s869_s15 }
  0x56   : > { %s194_s16 = scalar_lea.vmem [#allocation5], %s469_s5 }
  0x57   : > { %671 = dma.done.wait (%p970_p5), %s191_s29, 32  }
  0x58   : > { %673 = vsyncadd (%p970_p5), %s191_s29, 4294967264  ;;  %vm230_vm0 = vcmask 1043456   ;;  %v223_v0 = vld [vmem:[%s185_s6] sm:$0xff]  ;;  %v273_v13 = vlaneseq  ;;  %v887_v16 = vld [vmem:[%s194_s16] sm:$0x3]  ;;  %s219_s21 = scalar_lea.vmem [#allocation7], %s469_s5 }
  0x59   : > { %v228_v1 = vcombine.high %v223_v0, %v223_v0  ;;  %v231_v2 = vsel %vm230_vm0, %v223_v0, -inf  ;;  %vm225_vm1 = vcmp.ne.s32.totalorder %v887_v16, 4294967295  ;;  %v704_v58 = vmov 1966171168   ;;  %s347_s19 = sshll.u32 %s219_s21, 4  ;;  %s478_s30 = sshll.u32 %s692_s12, 5  ;;  %s902_s19 = int_to_ptr.vmem [resolvable:$true] %s347_s19 }
  0x5a   : > { %v232_v3 = vrot.slane %v231_v2, 4  ;;  %v274_v18 = vshrl.u32 %v273_v13, 7  ;;  %v226_v22 = vsel %vm225_vm1, %v887_v16, 0  ;;  %v310_v59 = vunpack.c.l.s4 %v704_v58  ;;  %s907_s27 = scalar_lea.hbm %s958_s2, %s478_s30  ;;  %s331_s28 = scalar_lea.sflag [#allocation4], %s869_s15 }
  0x5b   : > { %v238_v4 = vsel %vm230_vm0, %v228_v1, -inf  ;;  %vm327_vm4 = vcmp.lt.s32.totalorder %v273_v13, 256  ;;  %s614_s25 = scalar_lea.vmem %s902_s19, 32  ;;  %p971_p0 = scmp.ne.s32.totalorder %s963_s22, 0 }
  0x5c   : > { %v233_v5 = vmax.f32 %v231_v2, %v232_v3  ;;  %v239_v6 = vrot.slane %v238_v4, 4  ;;  %v277_v21 = vsub.s32 0, %v274_v18  ;;  %v281_v24 = vsub.s32 1, %v274_v18  ;;  %p615_p8 = scmp.ne.s32.totalorder %s902_s19, %s614_s25  ;;  %s705_s12 = smov [#allocation7]  }
  0x5d   : > { %s618_s3 = sshll.u32 %s705_s12, 4  ;;  %s619_s3 = int_to_ptr.vmem [resolvable:$false] %s618_s3 }
  0x5e   : > { %v234_v7 = vrot.slane %v233_v5, 2  ;;  %v240_v8 = vmax.f32 %v238_v4, %v239_v6  ;;  %v278_v25 = vrot.slane %v226_v22, %v277_v21  ;;  %v282_v26 = vrot.slane %v226_v22, %v281_v24  ;;  %p616_p7 = pnand %p615_p8, %p971_p0  ;;  %s620_s7 = scalar_lea.vmem %s619_s3, 64 }
  0x5f   : > { %p621_p10 = scmp.lt.s32.totalorder %s902_s19, %s619_s3  ;;  %p622_p12 = scmp.lt.s32.totalorder %s620_s7, %s614_s25 }
  0x60   : > { %v235_v9 = vmax.f32 %v233_v5, %v234_v7  ;;  %v241_v10 = vrot.slane %v240_v8, 2  ;;  %vm283_vm2 = vcmp.eq.s32.totalorder %v274_v18, %v278_v25  ;;  %vm284_vm3 = vcmp.eq.s32.totalorder %v274_v18, %v282_v26  ;;  %p617_p4 = pneg %p616_p7 }
  0x61   : > { %p623_p1 = por %p622_p12, %p621_p10 }
  0x62   : > { %v236_v11 = vrot.slane %v235_v9, 1  ;;  %v242_v12 = vmax.f32 %v240_v8, %v241_v10 }
  0x63   : > { %p624_p2 = pnand %p623_p1, %p617_p4 }
  0x64   : > { %v237_v14 = vmax.f32 %v235_v9, %v236_v11  ;;  %v243_v15 = vrot.slane %v242_v12, 1 }
  0x66   : > { %v244_v17 = vmax.f32 %v242_v12, %v243_v15 }
  0x68   : > { %v247_v19 = vcombine.low %v237_v14, %v244_v17 }
  0x6a   : > { %v249_v20 = vsub.f32 %v223_v0, %v247_v19  ;;  %v311_v0 = vunpack.c.0.s8 %v310_v59 }
  0x6c   : > { %v250_v23 = vmul.f32 1.442695, %v249_v20  ;;  %v286_v27 = vcombine.high %v249_v20, %v249_v20  ;;  %v288_v28 = vsel %vm283_vm2, %v249_v20, 0.0  ;;  %v314_v5 = vsub.s32 %v311_v0, %v274_v18 }
  0x6d   : > { %v290_v31 = vsel %vm230_vm0, %v288_v28, 0.0 }
  0x6e   : > { %548 = vpow2.f32 %v250_v23  ;;  %v289_v29 = vsel %vm284_vm3, %v286_v27, 0.0  ;;  %v291_v37 = vrot.slane %v290_v31, 4 }
  0x6f   : > { %v297_v35 = vsel %vm230_vm0, %v289_v29, 0.0 }
  0x70   : > { %v298_v40 = vrot.slane %v297_v35, 4  ;;  %v292_v43 = vadd.f32 %v291_v37, %v290_v31 }
  0x72   : > { %v299_v46 = vadd.f32 %v298_v40, %v297_v35  ;;  %v293_v49 = vrot.slane %v292_v43, 2 }
  0x74   : > { %v300_v52 = vrot.slane %v299_v46, 2  ;;  %v294_v54 = vadd.f32 %v293_v49, %v292_v43 }
  0x76   : > { %v301_v55 = vadd.f32 %v300_v52, %v299_v46  ;;  %v295_v56 = vrot.slane %v294_v54, 1 }
  0x78   : > { %v549_v30 = vpop.eup %548  ;;  %v302_v57 = vrot.slane %v301_v55, 1  ;;  %v296_v60 = vadd.f32 %v295_v56, %v294_v54 }
  0x79   : > { %v253_v32 = vcombine.high %v549_v30, %v549_v30  ;;  %v255_v33 = vsel %vm230_vm0, %v549_v30, 0.0 }
  0x7a   : > { %v256_v34 = vrot.slane %v255_v33, 4  ;;  %v303_v63 = vadd.f32 %v302_v57, %v301_v55 }
  0x7b   : > { %v262_v36 = vsel %vm230_vm0, %v253_v32, 0.0 }
  0x7c   : > { %v257_v38 = vadd.f32 %v256_v34, %v255_v33  ;;  %v263_v39 = vrot.slane %v262_v36, 4 }
  0x7e   : > { %v258_v41 = vrot.slane %v257_v38, 2  ;;  %v264_v42 = vadd.f32 %v263_v39, %v262_v36 }
  0x80   : > { %v259_v44 = vadd.f32 %v258_v41, %v257_v38  ;;  %v265_v45 = vrot.slane %v264_v42, 2 }
  0x82   : > { %v260_v47 = vrot.slane %v259_v44, 1  ;;  %v266_v48 = vadd.f32 %v265_v45, %v264_v42 }
  0x84   : > { %v261_v50 = vadd.f32 %v260_v47, %v259_v44  ;;  %v267_v51 = vrot.slane %v266_v48, 1 }
  0x86   : > { %v268_v53 = vadd.f32 %v267_v51, %v266_v48  ;;  %550 = vlog2.f32 %v261_v50 }
  0x88   : > { %552 = vlog2.f32 %v268_v53 }
  0x90   : > { %v551_v61 = vpop.eup %550 }
  0x91   : > { %v270_v62 = vmul.f32 0.6931472, %v551_v61 }
  0x92   : > { %v553_v1 = vpop.eup %552 }
  0x93   : > { %v272_v2 = vmul.f32 0.6931472, %v553_v1  ;;  %v304_v3 = vsub.f32 %v296_v60, %v270_v62 }
  0x95   : > { %v305_v4 = vsub.f32 %v303_v63, %v272_v2 }
  0x97   : > { %v308_v6 = vcombine.low %v304_v3, %v305_v4 }
  0x99   : > { %v315_v7 = vrot.slane %v308_v6, %v314_v5 }
  0x9b   : > { %v322_v8 = vrot.slane %v315_v7, %v314_v5 }
  0x9d   : > { %v324_v9 = vsel %vm225_vm1, %v322_v8, inf }
  0x9e   : > { %329 = vst.msk [vmem:[%s219_s21] sm:$0x3] %vm327_vm4, %v324_v9 }
  0x9f   : > { %627 = shalt.err (!%p624_p2)
}
  0xa0   : > { %s628_s8 = scalar_lea.hbm %s907_s27, 32  ;;  %s632_s4 = scalar_lea.hbm %s958_s2, 64 }
  0xa1   : > { %p629_p9 = scmp.ne.s32.totalorder %s907_s27, %s628_s8  ;;  %p633_p6 = scmp.lt.u32.totalorder %s907_s27, %s958_s2 }
  0xa2   : > { %p634_p13 = scmp.lt.u32.totalorder %s632_s4, %s628_s8  ;;  %p636_p8 = scmp.lt.u32.totalorder %s628_s8, %s907_s27 }
  0xa3   : > { %p630_p11 = pnand %p629_p9, %p971_p0 }
  0xa4   : > { %p635_p5 = por %p634_p13, %p633_p6 }
  0xa5   : > { %p631_p3 = pneg %p630_p11 }
  0xa6   : > { %p637_p7 = por %p636_p8, %p635_p5 }
  0xa8   : > { %p638_p4 = pnand %p637_p7, %p631_p3 }
  0xaa   : > { %641 = shalt.err (!%p638_p4)
}
  0xab   : > { %483 = dma.vmem_to_hbm [thread:$0]  (%p971_p0), %s902_s19, 32, %s907_s27, %s331_s28  }
  0xac PF: > { %s359_s29 = sand.u32 1, %s680_s9   ;;  %p972_p10 = scmp.ne.s32.totalorder %s964_s24, 0 }
  0xad   : > { %p973_p12 = scmp.ge.s32.totalorder %s700_s14, 2  ;;  %s360_s16 = scalar_lea.sflag [#allocation4], %s359_s29 }
  0xaf   : > { %p493_p1 = pnand %p973_p12, %p972_p10 }
  0xb1   : > { %675 = dma.done.wait (!%p493_p1), %s360_s16, 32  }
  0xb2   : > { %677 = vsyncadd (!%p493_p1), %s360_s16, 4294967264  ;;  %s21_s14 = sadd.s32 1, %s700_s14   ;;  %s974_s9 = smov %s684_s10 }
  0xb3   : > { %p18_p2 = scmp.ge.s32.totalorder %s21_s14, 4   ;;  %s975_s10 = smov %s688_s11 }
  0xb4   : > { %s976_s11 = smov %s777_s23  ;;  %s977_s12 = smov %s696_s13 }
  0xb5   : > { %s978_s13 = smov %s980_s17  ;;  %20 = sbr.rel (!%p18_p2) target bundleno = 8 (0x8), region = 86 }
  0xbc   :  { %365 = vsyncpa [#allocation3], 1 }
  0xbd   :  { %367 = vsyncpa [#allocation3 + $0x1], 1 }
  0xbe   :  { %368 = vsyncpa [#allocation6], 1 }
  0xbf   :  { %370 = vsyncpa [#allocation6 + $0x1], 1 }
  0xc0   :  { %371 = vsyncpa [#allocation4], 1 }
  0xc1   :  { %373 = vsyncpa [#allocation4 + $0x1], 1 }

</bundles_post_ra>
